<compile_context>
chip_gen: v5e
topology: v5e:2x2
jax: 0.10.0
libtpu: 0.0.40
codegen_flags: <defaults>
</compile_context>

<pallas_src>
import functools

import jax
import jax.numpy as jnp
from jax.experimental import pallas as pl
from jax.experimental.pallas import tpu as pltpu

EPS = 1e-5  # PyTorch BatchNorm1d default eps


def _round_up(x, m):
    return (x + m - 1) // m * m


# --------------------------------------------------------------------------- #
# Kernel
# --------------------------------------------------------------------------- #
def deepfm_kernel(x_ref, w_ref, b_ref, o_ref, *, dims):
    F, FE, E, H, OP = dims["F"], dims["FE"], dims["E"], dims["H"], dims["OUT_PAD"]
    off = dims["off"]
    f32, bf16 = jnp.float32, jnp.bfloat16
    dot = functools.partial(jnp.dot, preferred_element_type=f32)

    # Packed per-row features (all BatchNorms already folded in the wrapper):
    #   cols [0, F)       : first-order features   (FM first order)
    #   cols [F, F+F*E)   : second-order features  (flattened [F, E])
    first = x_ref[:, 0:F]                               # [TB, F]  f32
    so = x_ref[:, F:F + FE]                             # [TB, FE] f32
    so_bf = so.astype(bf16)

    # ---- FM second order: 0.5 * ((sum_f v_f)^2 - sum_f v_f^2) ---------------
    # Field-sum expressed as one pooling matmul (kept in f32 for accuracy).
    P = w_ref[off["P"]:off["P"] + FE, 0:E].astype(f32)  # [FE, E] (0/1 pattern)
    s = dot(so, P)                                      # [TB, E]
    ss = dot(so * so, P)                                # [TB, E]
    fm2 = 0.5 * (s * s - ss)                            # [TB, E]

    # ---- MLP hidden blocks (Linear + BN + ReLU, BN pre-folded into W/b) -----
    W1 = w_ref[off["W1"]:off["W1"] + FE, 0:H]           # [FE, H] bf16
    h = jnp.maximum(dot(so_bf, W1) + b_ref[0:1, 0:H], 0.0)
    W2 = w_ref[off["W2"]:off["W2"] + H, 0:H]            # [H, H]  bf16
    h = jnp.maximum(dot(h.astype(bf16), W2) + b_ref[1:2, 0:H], 0.0)

    # ---- final dense over concat([FM_first, FM_second, Deep]) ---------------
    # MLP output Linear is folded through the dense layer (Wdeep = Wout@Wd_deep),
    # and all final weights are zero-padded to OUT_PAD lanes -> lane-dense store.
    Wfirst = w_ref[off["Wfirst"]:off["Wfirst"] + F, 0:OP]
    Wfm = w_ref[off["Wfm"]:off["Wfm"] + E, 0:OP]
    Wdeep = w_ref[off["Wdeep"]:off["Wdeep"] + H, 0:OP]
    out = (dot(first.astype(bf16), Wfirst)
           + dot(fm2.astype(bf16), Wfm)
           + dot(h.astype(bf16), Wdeep)
           + b_ref[2:3, 0:OP])                          # [TB, OUT_PAD] f32
    o_ref[...] = out


# --------------------------------------------------------------------------- #
# Parameters (synthetic, shapes follow the PyTorch __init__)
# --------------------------------------------------------------------------- #
def make_params(key, nrof_cat, emb_dim, n_num, nrof_neurons, output_size,
                nrof_out_classes):
    n_emb = len(nrof_cat)
    F = n_emb + n_num
    keys = iter(jax.random.split(key, 64))

    def nrm(shape, scale=0.2):
        return (scale * jax.random.normal(next(keys), shape)).astype(jnp.float32)

    def bn_params(n):
        g = 1.0 + 0.1 * jax.random.normal(next(keys), (n,))
        b = 0.1 * jax.random.normal(next(keys), (n,))
        m = 0.1 * jax.random.normal(next(keys), (n,))
        v = 0.5 + jax.random.uniform(next(keys), (n,))
        return jnp.stack([g, b, m, v]).astype(jnp.float32)          # [4, n]

    return {
        "fo_tables": [nrm((c, 1)) for c in nrof_cat],                # Embedding(c, 1)
        "so_tables": [nrm((c, emb_dim)) for c in nrof_cat],          # Embedding(c, E)
        "w1_num": nrm((1, n_num)),
        "v_num": nrm((n_num, emb_dim)),
        "bn_num": bn_params(n_num),
        "bn1": bn_params(F),                                         # first_feature_bn
        "bn2": bn_params(F),                                         # second_feature_bn
        "W1": nrm((F * emb_dim, nrof_neurons)),                      # Linear as [in, out]
        "b1": nrm((1, nrof_neurons)),
        "mbn1": bn_params(nrof_neurons),
        "W2": nrm((nrof_neurons, nrof_neurons)),
        "b2": nrm((1, nrof_neurons)),
        "mbn2": bn_params(nrof_neurons),
        "Wout": nrm((nrof_neurons, output_size)),
        "bout": nrm((1, output_size)),
        "Wd": nrm((F + emb_dim + output_size, nrof_out_classes)),
        "bd": nrm((1, nrof_out_classes)),
        "emb_dim": emb_dim,
    }


# --------------------------------------------------------------------------- #
# Wrapper: fold BNs, pack inputs/params, launch gridded kernel
# --------------------------------------------------------------------------- #
def _bn_affine(p):
    g, b, m, v = p[0], p[1], p[2], p[3]
    s = g * jax.lax.rsqrt(v + EPS)
    return s, b - m * s


def _pack_rows(entries, width, dtype):
    """Stack 2-D arrays into one [R, width] blob; each entry's rows padded to x8."""
    blocks, offs, r = [], {}, 0
    for name, m in entries:
        offs[name] = r
        pr = _round_up(m.shape[0], 8)
        blk = jnp.zeros((pr, width), jnp.float32)
        blk = blk.at[:m.shape[0], :m.shape[1]].set(m.astype(jnp.float32))
        blocks.append(blk)
        r += pr
    return jnp.concatenate(blocks, axis=0).astype(dtype), offs


def deepfm_forward(params, cat_idx, numeric, *, block_b=1024):
    """cat_idx: [B, n_emb] int32, numeric: [B, n_num] float32 -> [B] float32."""
    B, n_emb = cat_idx.shape
    n_num = numeric.shape[1]
    E = params["emb_dim"]
    F = n_emb + n_num
    H = params["W2"].shape[0]
    C = params["bd"].shape[1]
    OUT_PAD = _round_up(max(C, 1), 128)
    BLOBW = max(OUT_PAD, H, E)

    # --- eval-mode BN as affine (scale, shift) --------------------------------
    s_num, t_num = _bn_affine(params["bn_num"])
    s1, t1 = _bn_affine(params["bn1"])
    s2, t2 = _bn_affine(params["bn2"])
    sm1, tm1 = _bn_affine(params["mbn1"])
    sm2, tm2 = _bn_affine(params["mbn2"])
    s1e, t1e, s1n, t1n = s1[:n_emb], t1[:n_emb], s1[n_emb:], t1[n_emb:]
    s2e, t2e, s2n, t2n = s2[:n_emb], t2[:n_emb], s2[n_emb:], t2[n_emb:]

    # --- per-row feature assembly (gathers + BN folding), fused by XLA --------
    fo_emb_bn = jnp.stack(
        [params["fo_tables"][i][cat_idx[:, i], 0] * s1e[i] + t1e[i]
         for i in range(n_emb)], axis=1)                               # [B, n_emb]
    a_fo = s_num * params["w1_num"][0] * s1n
    c_fo = t_num * params["w1_num"][0] * s1n + t1n
    fo_num_bn = numeric * a_fo[None, :] + c_fo[None, :]                # [B, n_num]

    so_emb_bn = jnp.concatenate(
        [params["so_tables"][i][cat_idx[:, i]] * s2e[i] + t2e[i]
         for i in range(n_emb)], axis=1)                               # [B, n_emb*E]
    A_so = s_num[:, None] * params["v_num"] * s2n[:, None]             # [n_num, E]
    C_so = t_num[:, None] * params["v_num"] * s2n[:, None] + t2n[:, None]
    so_num_bn = (numeric[:, :, None] * A_so[None] + C_so[None]
                 ).reshape(B, n_num * E)                               # [B, n_num*E]

    packed = jnp.concatenate([fo_emb_bn, fo_num_bn, so_emb_bn, so_num_bn],
                             axis=1).astype(jnp.float32)               # [B, F*(1+E)]

    # --- weight folding --------------------------------------------------------
    W1f = params["W1"] * sm1[None, :]
    b1f = params["b1"] * sm1[None, :] + tm1[None, :]
    W2f = params["W2"] * sm2[None, :]
    b2f = params["b2"] * sm2[None, :] + tm2[None, :]

    Wd = params["Wd"]
    Wd_first, Wd_fm, Wd_deep = Wd[:F], Wd[F:F + E], Wd[F + E:]
    Wdeep_f = params["Wout"] @ Wd_deep                                 # [H, C]
    bd_f = params["bd"] + params["bout"] @ Wd_deep                     # [1, C]

    P = jnp.tile(jnp.eye(E, dtype=jnp.float32), (F, 1))                # [F*E, E]

    wblob, woff = _pack_rows(
        [("P", P), ("W1", W1f), ("W2", W2f),
         ("Wfirst", Wd_first), ("Wfm", Wd_fm), ("Wdeep", Wdeep_f)],
        BLOBW, jnp.bfloat16)
    bblob = jnp.zeros((8, BLOBW), jnp.float32)
    bblob = bblob.at[0, :H].set(b1f[0])
    bblob = bblob.at[1, :H].set(b2f[0])
    bblob = bblob.at[2, :C].set(bd_f[0])

    # --- batch tiling ----------------------------------------------------------
    TB = min(block_b, _round_up(B, 8))
    B_pad = _round_up(B, TB)
    if B_pad != B:
        packed = jnp.pad(packed, ((0, B_pad - B), (0, 0)))
    Wx = packed.shape[1]

    dims = dict(F=F, FE=F * E, E=E, H=H, OUT_PAD=OUT_PAD, off=woff)
    kernel = functools.partial(deepfm_kernel, dims=dims)

    flops = 2 * B_pad * (2 * F * E * E + F * E * H + H * H + (F + E + H) * OUT_PAD)
    bytes_accessed = B_pad * (Wx + OUT_PAD) * 4 + wblob.size * 2 + bblob.size * 4

    out = pl.pallas_call(
        kernel,
        out_shape=jax.ShapeDtypeStruct((B_pad, OUT_PAD), jnp.float32),
        grid=(B_pad // TB,),
        in_specs=[
            pl.BlockSpec((TB, Wx), lambda i: (i, 0)),          # packed per-row feats
            pl.BlockSpec(wblob.shape, lambda i: (0, 0)),       # constant weight blob
            pl.BlockSpec(bblob.shape, lambda i: (0, 0)),       # constant bias blob
        ],
        out_specs=pl.BlockSpec((TB, OUT_PAD), lambda i: (i, 0)),
        compiler_params=pltpu.CompilerParams(
            dimension_semantics=("parallel",),
            vmem_limit_bytes=64 * 1024 * 1024),
        cost_estimate=pl.CostEstimate(
            flops=int(flops), transcendentals=0,
            bytes_accessed=int(bytes_accessed)),
    )(packed, wblob, bblob)

    res = out[:B, :C]
    return res[:, 0] if C == 1 else res   # torch.squeeze(output, 1)


# --------------------------------------------------------------------------- #
if __name__ == "__main__":
    # Small, forward-consistent config:
    #   3 categorical columns (card. 10, 7, 5), 2 numeric columns, emb_dim=4,
    #   nrof_layers=3 (2 hidden blocks), nrof_neurons=32, output_size=8,
    #   nrof_out_classes=1, batch=8.
    nrof_cat = [10, 7, 5]
    emb_dim = 4
    n_num = 2
    nrof_neurons = 32
    output_size = 8
    nrof_out_classes = 1
    B = 8

    key = jax.random.PRNGKey(0)
    k_par, k_idx, k_num = jax.random.split(key, 3)

    params = make_params(k_par, nrof_cat, emb_dim, n_num, nrof_neurons,
                         output_size, nrof_out_classes)

    cat_idx = jnp.stack(
        [jax.random.randint(jax.random.fold_in(k_idx, i), (B,), 0, c)
         for i, c in enumerate(nrof_cat)], axis=1).astype(jnp.int32)   # [B, 3]
    numeric = jax.random.normal(k_num, (B, n_num), dtype=jnp.float32)   # [B, 2]

    out = deepfm_forward(params, cat_idx, numeric)
    jax.block_until_ready(out)
    assert out.shape == (B,) and out.dtype == jnp.float32
    assert bool(jnp.all(jnp.isfinite(out)))
    print("KERNEL_OK")
</pallas_src>

<mosaic_0001>
module attributes {stable_mosaic.version = 11 : i64} {
  func.func @deepfm_kernel(%arg0: i32, %arg1: memref<8x25xf32, #tpu.memory_space<vmem>>, %arg2: memref<128x128xbf16, #tpu.memory_space<vmem>>, %arg3: memref<8x128xf32, #tpu.memory_space<vmem>>, %arg4: memref<8x128xf32, #tpu.memory_space<vmem>>) attributes {dimension_semantics = [#tpu.dimension_semantics<parallel>], iteration_bounds = array<i64: 1>, scalar_prefetch = 0 : i64, scratch_operands = 0 : i64, tpu.core_type = #tpu.core_type<tc>, window_params = [{transform_indices = @transform_0, window_bounds = array<i64: 8, 25>}, {pipeline_mode = #tpu.pipeline_mode<synchronous>, transform_indices = @transform_1, window_bounds = array<i64: 128, 128>}, {pipeline_mode = #tpu.pipeline_mode<synchronous>, transform_indices = @transform_2, window_bounds = array<i64: 8, 128>}, {transform_indices = @transform_3, window_bounds = array<i64: 8, 128>}]} {
    %c0 = arith.constant 0 : index
    %c0_0 = arith.constant 0 : index
    %0 = vector.load %arg1[%c0, %c0_0] : memref<8x25xf32, #tpu.memory_space<vmem>>, vector<8x5xf32>
    %c0_1 = arith.constant 0 : index
    %c5 = arith.constant 5 : index
    %1 = vector.load %arg1[%c0_1, %c5] : memref<8x25xf32, #tpu.memory_space<vmem>>, vector<8x20xf32>
    %2 = arith.truncf %1 : vector<8x20xf32> to vector<8x20xbf16>
    %c0_2 = arith.constant 0 : index
    %c0_3 = arith.constant 0 : index
    %3 = vector.load %arg2[%c0_2, %c0_3] : memref<128x128xbf16, #tpu.memory_space<vmem>>, vector<20x4xbf16>
    %4 = arith.extf %3 : vector<20x4xbf16> to vector<20x4xf32>
    %cst = arith.constant dense<0.000000e+00> : vector<8x4xf32>
    %5 = tpu.matmul %1, %4, %cst {dimension_numbers = #tpu.dot_dimension_numbers<[1], [0], [0], [1], [0, 0, 1, 1], [], []>} : vector<8x20xf32>, vector<20x4xf32>, vector<8x4xf32> -> vector<8x4xf32>
    %6 = arith.mulf %1, %1 : vector<8x20xf32>
    %cst_4 = arith.constant dense<0.000000e+00> : vector<8x4xf32>
    %7 = tpu.matmul %6, %4, %cst_4 {dimension_numbers = #tpu.dot_dimension_numbers<[1], [0], [0], [1], [0, 0, 1, 1], [], []>} : vector<8x20xf32>, vector<20x4xf32>, vector<8x4xf32> -> vector<8x4xf32>
    %8 = arith.mulf %5, %5 : vector<8x4xf32>
    %9 = arith.subf %8, %7 : vector<8x4xf32>
    %cst_5 = arith.constant 5.000000e-01 : f32
    %10 = vector.broadcast %cst_5 : f32 to vector<8x4xf32>
    %11 = arith.mulf %10, %9 : vector<8x4xf32>
    %c24 = arith.constant 24 : index
    %c0_6 = arith.constant 0 : index
    %12 = vector.load %arg2[%c24, %c0_6] : memref<128x128xbf16, #tpu.memory_space<vmem>>, vector<20x32xbf16>
    %cst_7 = arith.constant dense<0.000000e+00> : vector<8x32xf32>
    %13 = tpu.matmul %2, %12, %cst_7 {dimension_numbers = #tpu.dot_dimension_numbers<[1], [0], [0], [1], [0, 0, 1, 1], [], []>} : vector<8x20xbf16>, vector<20x32xbf16>, vector<8x32xf32> -> vector<8x32xf32>
    %c0_8 = arith.constant 0 : index
    %c0_9 = arith.constant 0 : index
    %14 = vector.load %arg3[%c0_8, %c0_9] : memref<8x128xf32, #tpu.memory_space<vmem>>, vector<1x32xf32>
    %15 = vector.broadcast %14 : vector<1x32xf32> to vector<8x32xf32>
    %16 = arith.addf %13, %15 : vector<8x32xf32>
    %cst_10 = arith.constant 0.000000e+00 : f32
    %17 = vector.broadcast %cst_10 : f32 to vector<8x32xf32>
    %18 = arith.maximumf %16, %17 : vector<8x32xf32>
    %c48 = arith.constant 48 : index
    %c0_11 = arith.constant 0 : index
    %19 = vector.load %arg2[%c48, %c0_11] : memref<128x128xbf16, #tpu.memory_space<vmem>>, vector<32x32xbf16>
    %20 = arith.truncf %18 : vector<8x32xf32> to vector<8x32xbf16>
    %cst_12 = arith.constant dense<0.000000e+00> : vector<8x32xf32>
    %21 = tpu.matmul %20, %19, %cst_12 {dimension_numbers = #tpu.dot_dimension_numbers<[1], [0], [0], [1], [0, 0, 1, 1], [], []>} : vector<8x32xbf16>, vector<32x32xbf16>, vector<8x32xf32> -> vector<8x32xf32>
    %c1 = arith.constant 1 : index
    %c0_13 = arith.constant 0 : index
    %22 = vector.load %arg3[%c1, %c0_13] : memref<8x128xf32, #tpu.memory_space<vmem>>, vector<1x32xf32>
    %23 = vector.broadcast %22 : vector<1x32xf32> to vector<8x32xf32>
    %24 = arith.addf %21, %23 : vector<8x32xf32>
    %cst_14 = arith.constant 0.000000e+00 : f32
    %25 = vector.broadcast %cst_14 : f32 to vector<8x32xf32>
    %26 = arith.maximumf %24, %25 : vector<8x32xf32>
    %c80 = arith.constant 80 : index
    %c0_15 = arith.constant 0 : index
    %27 = vector.load %arg2[%c80, %c0_15] : memref<128x128xbf16, #tpu.memory_space<vmem>>, vector<5x128xbf16>
    %c88 = arith.constant 88 : index
    %c0_16 = arith.constant 0 : index
    %28 = vector.load %arg2[%c88, %c0_16] : memref<128x128xbf16, #tpu.memory_space<vmem>>, vector<4x128xbf16>
    %c96 = arith.constant 96 : index
    %c0_17 = arith.constant 0 : index
    %29 = vector.load %arg2[%c96, %c0_17] : memref<128x128xbf16, #tpu.memory_space<vmem>>, vector<32x128xbf16>
    %30 = arith.truncf %0 : vector<8x5xf32> to vector<8x5xbf16>
    %cst_18 = arith.constant dense<0.000000e+00> : vector<8x128xf32>
    %31 = tpu.matmul %30, %27, %cst_18 {dimension_numbers = #tpu.dot_dimension_numbers<[1], [0], [0], [1], [0, 0, 1, 1], [], []>} : vector<8x5xbf16>, vector<5x128xbf16>, vector<8x128xf32> -> vector<8x128xf32>
    %32 = arith.truncf %11 : vector<8x4xf32> to vector<8x4xbf16>
    %cst_19 = arith.constant dense<0.000000e+00> : vector<8x128xf32>
    %33 = tpu.matmul %32, %28, %cst_19 {dimension_numbers = #tpu.dot_dimension_numbers<[1], [0], [0], [1], [0, 0, 1, 1], [], []>} : vector<8x4xbf16>, vector<4x128xbf16>, vector<8x128xf32> -> vector<8x128xf32>
    %34 = arith.addf %31, %33 : vector<8x128xf32>
    %35 = arith.truncf %26 : vector<8x32xf32> to vector<8x32xbf16>
    %cst_20 = arith.constant dense<0.000000e+00> : vector<8x128xf32>
    %36 = tpu.matmul %35, %29, %cst_20 {dimension_numbers = #tpu.dot_dimension_numbers<[1], [0], [0], [1], [0, 0, 1, 1], [], []>} : vector<8x32xbf16>, vector<32x128xbf16>, vector<8x128xf32> -> vector<8x128xf32>
    %37 = arith.addf %34, %36 : vector<8x128xf32>
    %c2 = arith.constant 2 : index
    %c0_21 = arith.constant 0 : index
    %38 = vector.load %arg3[%c2, %c0_21] : memref<8x128xf32, #tpu.memory_space<vmem>>, vector<1x128xf32>
    %39 = vector.broadcast %38 : vector<1x128xf32> to vector<8x128xf32>
    %40 = arith.addf %37, %39 : vector<8x128xf32>
    %c0_22 = arith.constant 0 : index
    %c0_23 = arith.constant 0 : index
    %41 = vector.load %arg4[%c0_22, %c0_23] : memref<8x128xf32, #tpu.memory_space<vmem>>, vector<8x128xf32>
    tpu.vector_store %arg4[%c0_22, %c0_23], %40 {strides = array<i32>} : memref<8x128xf32, #tpu.memory_space<vmem>>, vector<8x128xf32>,
    return
  }
  func.func @transform_0(%arg0: i32) -> (i32, i32) {
    %c0_i32 = arith.constant 0 : i32
    %c0_i32_0 = arith.constant 0 : i32
    return %arg0, %c0_i32 : i32, i32
  }
  func.func @transform_1(%arg0: i32) -> (i32, i32) {
    %c0_i32 = arith.constant 0 : i32
    %c0_i32_0 = arith.constant 0 : i32
    %c0_i32_1 = arith.constant 0 : i32
    return %c0_i32, %c0_i32_0 : i32, i32
  }
  func.func @transform_2(%arg0: i32) -> (i32, i32) {
    %c0_i32 = arith.constant 0 : i32
    %c0_i32_0 = arith.constant 0 : i32
    %c0_i32_1 = arith.constant 0 : i32
    return %c0_i32, %c0_i32_0 : i32, i32
  }
  func.func @transform_3(%arg0: i32) -> (i32, i32) {
    %c0_i32 = arith.constant 0 : i32
    %c0_i32_0 = arith.constant 0 : i32
    return %arg0, %c0_i32 : i32, i32
  }
}

</mosaic_0001>

<bundles_post_ra>
// kernel: tpu_custom_call.1
= control target key start
LH: loop header
LB: loop body
LE: loop exit
PB: predicated region body
PF: predicated region fallthrough
CT: control target
= control target key end

     0   :  { %8 = vsyncpa [#allocation3], 0  ;;  %s506_s0 = inlined_call_operand.hbm [shape: f32[8,25], index: 0, kind: input, shape index: {}]   ;;  %s507_s1 = inlined_call_operand.hbm [shape: bf16[128,128], index: 1, kind: input, shape index: {}]   ;;  %s508_s2 = inlined_call_operand.hbm [shape: f32[8,128], index: 2, kind: input, shape index: {}]   ;;  %s509_s3 = inlined_call_operand.hbm [shape: f32[8,128], index: 3, kind: output, shape index: {}]  }
   0x1   :  { %9 = vsyncpa [#allocation6], 0  ;;  %s26_s14 = sshll.u32 %s507_s1, 4  ;;  %s27_s14 = int_to_ptr.hbm [resolvable:$true] %s26_s14 }
   0x2   :  { %10 = vsyncpa [#allocation4], 0  ;;  %s454_s15 = smov [#allocation5]   ;;  %s16_s19 = sshll.u32 %s506_s0, 4  ;;  %s17_s19 = int_to_ptr.hbm [resolvable:$true] %s16_s19 }
   0x3   :  { %s28_s16 = sshll.u32 %s454_s15, 4  ;;  %s455_s20 = smov 64   ;;  %s29_s16 = int_to_ptr.vmem [resolvable:$true] %s28_s16 }
   0x4   :  { %s456_s21 = smov 4   ;;  %s457_s22 = smov [#allocation2]  }
   0x5   :  { %34 = dma.hbm_to_vmem [thread:$0]  %s27_s14, 1024, %s29_s16, [#allocation6], %s455_s20, %s455_s20, %s456_s21  }
   0x6   :  { %s18_s23 = sshll.u32 %s457_s22, 4  ;;  %s40_s26 = sshll.u32 %s508_s2, 4  ;;  %s19_s23 = int_to_ptr.vmem [resolvable:$true] %s18_s23  ;;  %s41_s26 = int_to_ptr.hbm [resolvable:$true] %s40_s26 }
   0x7   :  { %21 = dma.hbm_to_vmem [thread:$0]  %s17_s19, 128, %s19_s23, [#allocation3]  }
   0x8   :  { %s458_s1 = smov [#allocation7]  }
   0x9   :  { %s42_s27 = sshll.u32 %s458_s1, 4  ;;  %s43_s27 = int_to_ptr.vmem [resolvable:$true] %s42_s27 }
   0xa   :  { %45 = dma.hbm_to_vmem [thread:$0]  %s41_s26, 128, %s43_s27, [#allocation6]  }
   0xb   :  { %448 = dma.done.wait [#allocation3], 128  }
   0xc   :  { %449 = vsyncadd [#allocation3], 4294967168 }
   0xd   :  { %450 = dma.done.wait [#allocation6], 1152  }
   0xe   :  { %451 = vsyncadd [#allocation6], 4294966144  ;;  %v59_v0 = vld [vmem:[#allocation2] sm:$0xff]  ;;  %v128_v1 = vld [vmem:[#allocation5 + $0x14] sm:$0x3]  ;;  %vm146_vm0 = vcmask 1041408  }
   0xf   :  { %v491_v2 = vpack.c.bf16 %v59_v0, %v59_v0  ;;  %v139_v3 = vunpack.c.l.b16 %v128_v1  ;;  %s459_s0 = smov 123   ;;  %v332_v6 = vld [vmem:[#allocation5 + $0xc] sm:$0xff]  ;;  %v97_v7 = vmul.f32 %v59_v0, %v59_v0  ;;  %vm70_vm1 = vcmask 162816   ;;  %v334_v9 = vld [vmem:[#allocation5 + $0x20] sm:$0xff]  ;;  %v63_v10 = vld [vmem:[#allocation5 + $0x8] sm:$0x3] }
  0x10   :  { %193 = vmatpush.bf16.msra.mxu3 %v334_v9  ;;  %v66_v11 = vunpack.c.l.bf16 %v63_v10  ;;  %v333_v12 = vld [vmem:[#allocation5 + $0x18] sm:$0xff]  ;;  %vm73_vm2 = vcmask 1043456   ;;  %v338_v13 = vld [vmem:[#allocation5] sm:$0xff]   ;;  %vm183_vm3 = vcmask 261120   ;;  %v335_v25 = vld [vmem:[#allocation5 + $0x30] sm:$0xff]  ;;  %vm232_vm4 = vcmask 1042432  }
  0x11   :  { %132 = vrot.lane.b32.xlu0 %v491_v2, %s459_s0  ;;  %v141_v4 = vpack.c.b16 %v139_v3, %v139_v3  ;;  %99 = vrot.lane.b32.xlu1 %v97_v7, %s459_s0  ;;  %v340_v14 = vunpack.c.h.bf16 %v338_v13  ;;  %v339_v15 = vunpack.c.l.bf16 %v338_v13  ;;  %v336_v18 = vld [vmem:[#allocation5 + $0x38] sm:$0xff]  ;;  %v349_v19 = vld [vmem:[#allocation7] ss:$0 sm:$0xff]  ;;  %v460_v29 = vmov 65535   ;;  %v201_v32 = vld [vmem:[#allocation5 + $0x28] sm:$0x7] }
  0x12   :  { %303 = vmatpush.msk.msra.mxu0 %vm73_vm2, %v66_v11  ;;  %305 = vmatpush.msk.msra.mxu1 %vm73_vm2, %v66_v11  ;;  %v233_v30 = vsel %vm146_vm0, 4294967295, %v460_v29  ;;  %v202_v34 = vld [vmem:[#allocation5 + $0x2c] sm:$0x3]  ;;  %vm208_vm5 = vcmask 31744   ;;  %vm228_vm6 = vcmask 39936   ;;  %s461_s2 = smov [#allocation8]  }
  0x13   :  { %v148_v5 = vsel %vm146_vm0, %v141_v4, 0  ;;  %v234_v33 = vsel %vm232_vm4, %v233_v30, 0  ;;  %v213_v37 = vsel %vm146_vm0, %v202_v34, 0  ;;  %v350_v39 = vld [vmem:[#allocation7 + $0x1] ss:$0 sm:$0xff]  ;;  %s290_s28 = sshll.u32 %s461_s2, 4  ;;  %s291_s28 = int_to_ptr.vmem [resolvable:$true] %s290_s28 }
  0x14   :  { %156 = vmatpush.bf16.msra.mxu2 %v148_v5  ;;  %194 = vmatpush.bf16.msra.mxu3 %v333_v12  ;;  %v236_v35 = vand.u32 %v234_v33, %v201_v32  ;;  %v351_v50 = vld [vmem:[#allocation7 + $0x2] ss:$0 sm:$0xff]  ;;  %s292_s4 = sshll.u32 %s509_s3, 4  ;;  %s293_s4 = int_to_ptr.hbm [resolvable:$true] %s292_s4 }
  0x15   :  { %91 = vmatpush.msra.mxu0 %v340_v14  ;;  %117 = vmatpush.msra.mxu1 %v340_v14 }
  0x17   :  { %92 = vmatpush.msra.mxu0 %v339_v15  ;;  %118 = vmatpush.msra.mxu1 %v339_v15 }
  0x18   :  { %157 = vmatpush.bf16.msra.mxu2 %v332_v6 }
  0x19   :  { %68 = vrot.lane.b32.xlu0 %v59_v0, %s459_s0  ;;  %222 = vmatpush.bf16.msrb.mxu0 %v213_v37 }
  0x1a   :  { %245 = vmatpush.bf16.msrb.mxu1 %v236_v35 }
  0x1c   :  { %273 = vmatpush.bf16.msrb.mxu2 %v336_v18 }
  0x20   :  { %274 = vmatpush.bf16.msrb.mxu2 %v335_v25 }
  0x83   :  { %v133_v8 = vpop.permute.xlu0 %132  ;;  %v100_v17 = vpop.permute.xlu1 %99 }
  0x84   :  { %311 = vmatmul.msk.bf16.vlgmr.msra.gmra.mxu2 %vm70_vm1, %v133_v8  ;;  %306 = vmatmul.msk.f32.vlgmr.msra.gmra.mxu1 %vm70_vm1, %v100_v17 }
  0x8b   :  { %v69_v16 = vpop.permute.xlu0 %68 }
  0x8c   :  { %304 = vmatmul.msk.f32.vlgmr.msra.gmra.mxu0 %vm70_vm1, %v69_v16  ;;  %322 = vmatmul.msk.bf16.vlgmr.msrb.gmra.mxu1 %vm228_vm6, %v491_v2 }
 0x101   :  { %v120_v28 = vpop.f32.mrf.mxu1 }
 0x107   :  { %v159_v20 = vpop.f32.mrf.mxu2 }
 0x108   :  { %v160_v21 = vadd.f32 %v349_v19, %v159_v20 }
 0x109   :  { %v94_v26 = vpop.f32.mrf.mxu0  ;;  %v247_v46 = vpop.f32.mrf.mxu1 }
 0x10a   :  { %v163_v22 = vmax.f32 %v160_v21, 0.0  ;;  %v123_v27 = vmul.f32 %v94_v26, %v94_v26 }
 0x10c   :  { %v168_v23 = vpack.c.bf16 %v163_v22, %v163_v22  ;;  %v124_v31 = vsub.f32 %v123_v27, %v120_v28 }
 0x10e   :  { %320 = vmatmul.msk.bf16.vlgmr.msra.gmra.mxu3 %vm183_vm3, %v168_v23  ;;  %v125_v36 = vmul.f32 0.5, %v124_v31 }
 0x10f   :  { %v161_v24 = vpop.f32.mrf.mxu2 }
 0x110   :  { %v207_v38 = vpack.c.bf16 %v125_v36, %v125_v36 }
 0x111   :  { %v249_v48 = vpop.f32.mrf.mxu1 }
 0x112   :  { %321 = vmatmul.msk.bf16.vlgmr.msrb.gmra.mxu0 %vm208_vm5, %v207_v38 }
 0x18f   :  { %v224_v45 = vpop.f32.mrf.mxu0 }
 0x190   :  { %v248_v49 = vadd.f32 %v247_v46, %v224_v45 }
 0x191   :  { %v196_v40 = vpop.f32.mrf.mxu3 }
 0x192   :  { %v197_v41 = vadd.f32 %v350_v39, %v196_v40 }
 0x194   :  { %v200_v42 = vmax.f32 %v197_v41, 0.0 }
 0x196   :  { %v251_v43 = vpack.c.bf16 %v200_v42, %v200_v42 }
 0x197   :  { %v226_v47 = vpop.f32.mrf.mxu0 }
 0x198   :  { %331 = vmatmul.msk.bf16.vlgmr.msrb.gmra.mxu2 %vm183_vm3, %v251_v43 }
 0x199   :  { %v198_v44 = vpop.f32.mrf.mxu3 }
 0x21b   :  { %v276_v51 = vpop.f32.mrf.mxu2 }
 0x21c   :  { %v280_v52 = vadd.f32 %v276_v51, %v248_v49 }
 0x21e   :  { %v283_v53 = vadd.f32 %v351_v50, %v280_v52 }
 0x220   :  { %284 = vst [vmem:[#allocation8] sm:$0xff] %v283_v53 }
 0x221   :  { %295 = dma.vmem_to_hbm [thread:$0]  %s291_s28, 128, %s293_s4, [#allocation4]  }
 0x223   :  { %v278_v54 = vpop.f32.mrf.mxu2 }
 0x224   :  { %452 = dma.done.wait [#allocation4], 128  }
 0x225   :  { %453 = vsyncadd [#allocation4], 4294967168 }
 0x226   :  { %300 = vsyncpa [#allocation3], 1 }
 0x227   :  { %301 = vsyncpa [#allocation6], 1 }
 0x228   :  { %302 = vsyncpa [#allocation4], 1 }

</bundles_post_ra>
